<compile_context>
chip_gen: v7x
topology: tpu7x:2x2x1
jax: 0.10.0
libtpu: 0.0.40
codegen_flags: <defaults>
</compile_context>

<pallas_src>
import functools
import math

import jax
import jax.numpy as jnp
from jax import lax
from jax.experimental import pallas as pl
from jax.experimental.pallas import tpu as pltpu

TAU = 0.1
INV_TAU = 1.0 / TAU
LOG_INV_TAU = math.log(INV_TAU)
NORM_EPS = 1e-12            # matches torch.nn.functional.normalize default eps
PAD_BIAS = -1e30            # additive bias for padded negative columns


def _round_up(x, m):
    return ((x + m - 1) // m) * m


def _l2_normalize(x):
    # x / max(||x||, eps)  ==  x * rsqrt(max(sum(x^2), eps^2))
    sq = jnp.sum(x * x, axis=-1, keepdims=True)
    return x * lax.rsqrt(jnp.maximum(sq, NORM_EPS * NORM_EPS))


# --------------------------------------------------------------------------- #
# Prologue: normalize negatives once, store as bf16 (halves the HBM stream).  #
# --------------------------------------------------------------------------- #
def _normalize_bf16_kernel(x_ref, o_ref):
    x = x_ref[...].astype(jnp.float32)
    o_ref[...] = _l2_normalize(x).astype(jnp.bfloat16)


def _normalize_negatives_bf16(negatives, tn, vmem_limit):
    n_pad, d = negatives.shape
    return pl.pallas_call(
        _normalize_bf16_kernel,
        out_shape=jax.ShapeDtypeStruct((n_pad, d), jnp.bfloat16),
        grid_spec=pltpu.PrefetchScalarGridSpec(
            num_scalar_prefetch=0,
            grid=(n_pad // tn,),
            in_specs=[pl.BlockSpec((tn, d), lambda i: (i, 0))],
            out_specs=pl.BlockSpec((tn, d), lambda i: (i, 0)),
        ),
        compiler_params=pltpu.CompilerParams(
            dimension_semantics=("parallel",),
            vmem_limit_bytes=vmem_limit),
    )(negatives)


# --------------------------------------------------------------------------- #
# Main kernel: online sumexp over streamed (pre-normalized bf16) negatives.   #
# --------------------------------------------------------------------------- #
def _causal_contrast_kernel(a_ref, p_ref, neg_ref, ats_ref, nts_ref, bias_ref,
                            out_ref, a_bf_ref, pos_logit_ref, s_ref):
    j = pl.program_id(1)
    n_steps = pl.num_programs(1)

    @pl.when(j == 0)
    def _init():
        a_n = _l2_normalize(a_ref[...].astype(jnp.float32))
        p_n = _l2_normalize(p_ref[...].astype(jnp.float32))
        a_bf_ref[...] = a_n.astype(jnp.bfloat16)
        logit_pos = jnp.sum(a_n * p_n, axis=-1, keepdims=True) * INV_TAU   # [tb, 1]
        pos_logit_ref[...] = logit_pos
        # Static LSE cap M = 1/tau (all logits are <= 1/tau in magnitude):
        # fold the positive logit into the running sumexp up front.
        s_ref[...] = jnp.exp(logit_pos - INV_TAU)

    a_bf = a_bf_ref[...]                    # [tb, D] bf16 (normalized)
    neg_bf = neg_ref[...]                   # [tn, D] bf16 (pre-normalized)

    # Contract on the last dim of BOTH operands -> MXU-direct, no XLU transpose.
    neg_sim = lax.dot_general(
        a_bf, neg_bf, (((1,), (1,)), ((), ())),
        preferred_element_type=jnp.float32)                                 # [tb, tn]

    ats = ats_ref[...]                      # [tb, 1]  (already scaled by 1/tau)
    nts = nts_ref[...]                      # [1, tn]  (already scaled by 1/tau)
    # (exp(-|dt|/tau) * neg_sim) / tau == neg_sim * exp(log(1/tau) - |dt|/tau)
    logit_neg = neg_sim * jnp.exp(LOG_INV_TAU - jnp.abs(ats - nts))
    # bias = -1/tau (valid) or -1e30 (padded column): folds "- M" in for free.
    s_ref[...] += jnp.sum(jnp.exp(logit_neg + bias_ref[...]),
                          axis=-1, keepdims=True)

    @pl.when(j == n_steps - 1)
    def _finalize():
        lse = INV_TAU + jnp.log(s_ref[...])
        out_ref[...] = lse - pos_logit_ref[...]          # per-example CE loss


def causal_contrast(anchor_emb, positive_emb, negative_embs, anchor_ts, negative_ts,
                    *, tb=None, tn=None):
    """anchor_emb/positive_emb: [B, D], negative_embs: [N, D],
    anchor_ts: [B] or [B,1], negative_ts: [N]. Returns scalar loss (f32)."""
    anchor = jnp.asarray(anchor_emb)
    positive = jnp.asarray(positive_emb)
    negatives = jnp.asarray(negative_embs)
    B, D = anchor.shape
    N = negatives.shape[0]

    if N == 0:
        # Degenerate: only the positive logit -> cross-entropy is exactly 0.
        return jnp.zeros((), jnp.float32)

    # Timestamps pre-scaled by 1/tau (1-D op) so the inner loop skips the
    # [tb, tn]-sized multiply.
    ats = jnp.reshape(anchor_ts, (-1, 1)).astype(jnp.float32) * INV_TAU     # [B, 1]
    nts = jnp.reshape(negative_ts, (1, -1)).astype(jnp.float32) * INV_TAU   # [1, N]

    if tb is None:
        tb = min(128, _round_up(B, 8))
        # v7x megacore: prefer >= 2 blocks along the parallel B axis when possible.
        if B > 8 and _round_up(B, tb) == tb:
            tb = max(8, _round_up((B + 1) // 2, 8))
    if tn is None:
        # Keep the double-buffered bf16 negatives stream around ~8 MiB and the
        # [tb, tn] f32 temps small; multiples of 256 keep the 256-wide MXU
        # (v6e/v7x) full along N.
        cap = (8 << 20) // (2 * 2 * D)            # elements of N for ~8 MiB x2 bf16
        cap = max(256, min(2048, (cap // 256) * 256))
        tn = min(cap, _round_up(N, 128))

    B_pad = _round_up(B, tb)
    N_pad = _round_up(N, tn)

    if B_pad != B:
        pad_b = B_pad - B
        anchor = jnp.pad(anchor, ((0, pad_b), (0, 0)))
        positive = jnp.pad(positive, ((0, pad_b), (0, 0)))
        ats = jnp.pad(ats, ((0, pad_b), (0, 0)))
    if N_pad != N:
        pad_n = N_pad - N
        negatives = jnp.pad(negatives, ((0, pad_n), (0, 0)))
        nts = jnp.pad(nts, ((0, 0), (0, pad_n)))

    # Additive column bias: -1/tau for valid negatives (folds the static LSE cap),
    # -1e30 for padded columns (exp -> 0). Built once, streamed as a [1, tn] tile.
    bias = jnp.where(jnp.arange(N_pad)[None, :] < N,
                     jnp.float32(-INV_TAU), jnp.float32(PAD_BIAS))

    # Explicit VMEM budget (double-buffered inputs/outputs + elementwise temps),
    # capped at 48 MiB so it also fits v7x's 64 MiB physical VMEM per TensorCore.
    vmem_est = (2 * 2 * tb * D * 4          # anchor + positive tiles (f32, x2 buffers)
                + 2 * tn * D * 2            # negatives tile (bf16, x2 buffers)
                + 6 * tb * tn * 4           # [tb, tn] f32 temps (sim/decay/exp)
                + 4 * 8 * tn * 4            # nts + bias ([1, tn], sublane-padded, x2)
                + tb * D * 2                # normalized-anchor bf16 scratch
                + 8 * tb * 128 * 4)         # small [tb, 1] buffers (lane-padded)
    vmem_limit = min(max(32 << 20, _round_up(vmem_est * 3 // 2, 1 << 20)), 48 << 20)

    # Prologue: normalize negatives once, store bf16 (removes per-B-tile renorm,
    # halves the streamed bytes — biggest win on bandwidth-bound v5e).
    negatives_bf16 = _normalize_negatives_bf16(negatives, tn, vmem_limit)

    grid = (B_pad // tb, N_pad // tn)

    per_example = pl.pallas_call(
        _causal_contrast_kernel,
        out_shape=jax.ShapeDtypeStruct((B_pad, 1), jnp.float32),
        grid_spec=pltpu.PrefetchScalarGridSpec(
            num_scalar_prefetch=0,
            grid=grid,
            in_specs=[
                pl.BlockSpec((tb, D), lambda i, j: (i, 0)),   # anchor   (resident over N)
                pl.BlockSpec((tb, D), lambda i, j: (i, 0)),   # positive (resident over N)
                pl.BlockSpec((tn, D), lambda i, j: (j, 0)),   # negatives bf16 (streamed)
                pl.BlockSpec((tb, 1), lambda i, j: (i, 0)),   # anchor ts / tau
                pl.BlockSpec((1, tn), lambda i, j: (0, j)),   # negative ts / tau (streamed)
                pl.BlockSpec((1, tn), lambda i, j: (0, j)),   # additive column bias
            ],
            out_specs=pl.BlockSpec((tb, 1), lambda i, j: (i, 0)),  # per-example loss
            scratch_shapes=[
                pltpu.VMEM((tb, D), jnp.bfloat16),  # normalized anchor (once per B tile)
                pltpu.VMEM((tb, 1), jnp.float32),   # positive logit
                pltpu.VMEM((tb, 1), jnp.float32),   # running sumexp (static cap = 1/tau)
            ],
        ),
        compiler_params=pltpu.CompilerParams(
            dimension_semantics=("parallel", "arbitrary"),   # B across TCs, N reduction
            vmem_limit_bytes=vmem_limit),
    )(anchor, positive, negatives_bf16, ats, nts, bias)

    return jnp.mean(per_example[:B, 0])


def _reference(anchor_emb, positive_emb, negative_embs, anchor_ts, negative_ts):
    # pure-JAX reference mirroring the PyTorch forward
    ats = jnp.reshape(anchor_ts, (-1, 1))
    nts = jnp.reshape(negative_ts, (1, -1))
    tw = jnp.exp(-jnp.abs(ats - nts) / TAU)

    def norm(x):
        return x / jnp.maximum(jnp.linalg.norm(x, axis=-1, keepdims=True), NORM_EPS)

    a, p, n = norm(anchor_emb), norm(positive_emb), norm(negative_embs)
    pos_sim = jnp.sum(a * p, axis=-1)
    neg_sim = a @ n.T
    logits = jnp.concatenate([pos_sim[:, None], neg_sim * tw], axis=1) / TAU
    lse = jax.scipy.special.logsumexp(logits, axis=-1)
    return jnp.mean(lse - logits[:, 0])


if __name__ == "__main__":
    # Small but tile-exercising shapes: (2, 2) grid with a masked (padded) last N tile.
    B, D, N = 16, 128, 200
    key = jax.random.PRNGKey(0)
    k1, k2, k3, k4, k5 = jax.random.split(key, 5)
    anchor_emb = jax.random.normal(k1, (B, D), dtype=jnp.float32)
    positive_emb = jax.random.normal(k2, (B, D), dtype=jnp.float32)
    negative_embs = jax.random.normal(k3, (N, D), dtype=jnp.float32)
    anchor_ts = jax.random.uniform(k4, (B,), dtype=jnp.float32)
    negative_ts = jax.random.uniform(k5, (N,), dtype=jnp.float32)

    loss = causal_contrast(anchor_emb, positive_emb, negative_embs,
                           anchor_ts, negative_ts, tb=8, tn=128)
    loss = jax.block_until_ready(loss)

    ref = _reference(anchor_emb, positive_emb, negative_embs, anchor_ts, negative_ts)
    # bf16 MXU path: cosine sims carry ~1e-3 relative error (x 1/tau in the logits).
    assert jnp.allclose(loss, ref, rtol=3e-2, atol=3e-2), (loss, ref)
    print("KERNEL_OK")
</pallas_src>

<mosaic_0001>
module attributes {stable_mosaic.version = 11 : i64} {
  func.func @_normalize_bf16_kernel(%arg0: i32, %arg1: memref<128x128xf32, #tpu.memory_space<vmem>>, %arg2: memref<128x128xbf16, #tpu.memory_space<vmem>>) attributes {dimension_semantics = [#tpu.dimension_semantics<parallel>], iteration_bounds = array<i64: 2>, scalar_prefetch = 0 : i64, scratch_operands = 0 : i64, tpu.core_type = #tpu.core_type<tc>, window_params = [{transform_indices = @transform_0, window_bounds = array<i64: 128, 128>}, {transform_indices = @transform_1, window_bounds = array<i64: 128, 128>}]} {
    %c0 = arith.constant 0 : index
    %c0_0 = arith.constant 0 : index
    %0 = vector.load %arg1[%c0, %c0_0] : memref<128x128xf32, #tpu.memory_space<vmem>>, vector<128x128xf32>
    %1 = arith.mulf %0, %0 : vector<128x128xf32>
    %cst = arith.constant dense<0.000000e+00> : vector<128xf32>
    %2 = vector.multi_reduction <add>, %1, %cst [1] : vector<128x128xf32> to vector<128xf32>
    %3 = vector.shape_cast %2 : vector<128xf32> to vector<128x1xf32>
    %cst_1 = arith.constant 1.000000e-24 : f32
    %4 = vector.broadcast %cst_1 : f32 to vector<128x1xf32>
    %5 = arith.maximumf %3, %4 : vector<128x1xf32>
    %6 = math.rsqrt %5 : vector<128x1xf32>
    %7 = vector.broadcast %6 : vector<128x1xf32> to vector<128x128xf32>
    %8 = arith.mulf %0, %7 : vector<128x128xf32>
    %9 = arith.truncf %8 : vector<128x128xf32> to vector<128x128xbf16>
    %c0_2 = arith.constant 0 : index
    %c0_3 = arith.constant 0 : index
    %10 = vector.load %arg2[%c0_2, %c0_3] : memref<128x128xbf16, #tpu.memory_space<vmem>>, vector<128x128xbf16>
    tpu.vector_store %arg2[%c0_2, %c0_3], %9 {strides = array<i32>} : memref<128x128xbf16, #tpu.memory_space<vmem>>, vector<128x128xbf16>,
    return
  }
  func.func @transform_0(%arg0: i32) -> (i32, i32) {
    %c0_i32 = arith.constant 0 : i32
    %c0_i32_0 = arith.constant 0 : i32
    return %arg0, %c0_i32 : i32, i32
  }
  func.func @transform_1(%arg0: i32) -> (i32, i32) {
    %c0_i32 = arith.constant 0 : i32
    %c0_i32_0 = arith.constant 0 : i32
    return %arg0, %c0_i32 : i32, i32
  }
}

</mosaic_0001>

<bundles_post_ra>
// kernel: tpu_custom_call.1
= control target key start
LH: loop header
LB: loop body
LE: loop exit
PB: predicated region body
PF: predicated region fallthrough
CT: control target
= control target key end

     0   :  { %6 = vsyncpa [#allocation3], 0  ;;  %s979_s0 = inlined_call_operand.hbm [shape: f32[256,128], index: 0, kind: input, shape index: {}]   ;;  %s980_s1 = inlined_call_operand.hbm [shape: bf16[256,128], index: 1, kind: output, shape index: {}]  }
   0x1   :  { %8 = vsyncpa [#allocation3 + $0x1], 0 }
   0x2   :  { %9 = vsyncpa [#allocation4], 0 }
   0x3   :  { %11 = vsyncpa [#allocation4 + $0x1], 0  ;;  %s707_s6 = smov 0   ;;  %s709_s7 = smov 0  }
   0x4   :  { %s711_s8 = smov 0   ;;  %s713_s9 = smov 0  }
   0x5 LB: > { %s728_s10 = sadd.s32 4294967295, %s689_s9   ;;  %s416_s11 = sadd.s32 4294967294, %s689_s9   ;;  %s689_s9 = sphi %s713_s9, %s993_s9   ;;  %s685_s8 = sphi %s711_s8, %s992_s8   ;;  %s681_s7 = sphi %s709_s7, %s991_s7   ;;  %s677_s6 = sphi %s707_s6, %s990_s6  }
   0x6   : > { %s732_s12 = sadd.s32 1, %s689_s9   ;;  %s24_s13 = sadd.s32 1, %s685_s8 }
   0x7   : > { %s21_s14 = ssub.s32 %s689_s9, %s732_s12  ;;  %p31_p0 = scmp.ne.s32.totalorder %s685_s8, %s681_s7 }
   0x8   : > { %p22_p1 = scmp.eq.s32.totalorder %s21_s14, 0  ;;  %p32_p2 = scmp.eq.s32.totalorder %s689_s9, 0 }
   0x9   : > { %p37_p3 = scmp.ne.s32.totalorder %s681_s7, %s677_s6  ;;  %p38_p4 = scmp.eq.s32.totalorder %s728_s10, 0 }
   0xa   : > { %s744_s15 = scalar_select %p22_p1, %s685_s8, %s24_s13  }
   0xb   : > { %p746_p5 = por %p32_p2, %p31_p0  ;;  %p750_p6 = por %p38_p4, %p37_p3 }
   0xc   : > { %p61_p7 = scmp.eq.s32.totalorder %s728_s10, 1  ;;  %p67_p8 = scmp.eq.s32.totalorder %s416_s11, 1 }
   0xd   : > { %p523_p10 = scmp.lt.s32.totalorder %s689_s9, 2  ;;  %s87_s20 = sand.u32 1, %s685_s8  }
   0xe   : > { %p757_p11 = por %p61_p7, %p31_p0  ;;  %p761_p12 = por %p67_p8, %p37_p3 }
   0xf   : > { %s446_s21 = sshll.u32 %s689_s9, 11  ;;  %s419_s22 = sshll.u32 %s87_s20, 7 }
  0x10   : > { %s984_s18 = scalar_select %p757_p11, 1, 0 }
  0x11   : > { %s985_s19 = scalar_select %p761_p12, 1, 0 }
  0x12   : > { %s770_s25 = scalar_lea.hbm %s979_s0, %s446_s21  ;;  %s91_s26 = scalar_lea.vmem [#allocation2], %s419_s22 }
  0x13   : > { %s98_s27 = sshll.u32 %s91_s26, 4  ;;  %p774_p13 = pnand %p523_p10, %p746_p5  ;;  %s778_s27 = int_to_ptr.vmem [resolvable:$true] %s98_s27 }
  0x14   : > { %s780_s29 = scalar_lea.sflag [#allocation3], %s87_s20  ;;  %s593_s30 = scalar_lea.hbm %s770_s25, 2048 }
  0x15   : > { %p594_p0 = scmp.ne.s32.totalorder %s770_s25, %s593_s30  ;;  %p595_p1 = pneg %p774_p13 }
  0x16   : > { %s598_s4 = scalar_lea.hbm %s979_s0, 4096  ;;  %p599_p4 = scmp.lt.u32.totalorder %s770_s25, %s979_s0 }
  0x17   : > { %p596_p2 = pnand %p595_p1, %p594_p0  ;;  %p600_p5 = scmp.lt.u32.totalorder %s598_s4, %s593_s30 }
  0x18   : > { %p602_p8 = scmp.lt.u32.totalorder %s593_s30, %s770_s25 }
  0x19   : > { %p597_p3 = pneg %p596_p2  ;;  %p601_p7 = por %p600_p5, %p599_p4 }
  0x1b   : > { %p603_p10 = por %p602_p8, %p601_p7 }
  0x1d   : > { %p604_p9 = pnand %p603_p10, %p597_p3 }
  0x1f   : > { %607 = shalt.err (!%p604_p9)
}
  0x20   : > { %s608_s13 = scalar_lea.vmem %s778_s27, 2048  ;;  %s691_s14 = smov [#allocation2]  }
  0x21   : > { %p609_p0 = scmp.ne.s32.totalorder %s778_s27, %s608_s13  ;;  %s613_s16 = sshll.u32 %s691_s14, 4  ;;  %s614_s16 = int_to_ptr.vmem [resolvable:$false] %s613_s16 }
  0x22   : > { %s615_s20 = scalar_lea.vmem %s614_s16, 4096  ;;  %p616_p11 = scmp.lt.s32.totalorder %s778_s27, %s614_s16 }
  0x23   : > { %p611_p2 = pnand %p609_p0, %p595_p1  ;;  %p617_p4 = scmp.lt.s32.totalorder %s615_s20, %s608_s13 }
  0x25   : > { %p612_p12 = pneg %p611_p2  ;;  %p618_p5 = por %p617_p4, %p616_p11 }
  0x27   : > { %p619_p7 = pnand %p618_p5, %p612_p12 }
  0x29   : > { %622 = shalt.err (!%p619_p7)
}
  0x2a   : > { %s692_s21 = smov 128   ;;  %s693_s22 = smov 8  }
  0x2b   : > { %518 = dma.hbm_to_vmem [thread:$0]  (!%p774_p13), %s770_s25, 2048, %s778_s27, %s780_s29, %s692_s21, %s692_s21, %s693_s22  }
  0x2c   : > { %p422_p9 = scmp.ge.s32.totalorder %s689_s9, 1  ;;  %p106_p1 = scmp.lt.s32.totalorder %s689_s9, 3 }
  0x2e   : > { %p107_p3 = pnand %p422_p9, %p106_p1 }
  0x2f   : > { %s811_s23 = sand.u32 (!%p107_p3), 1, %s681_s7  }
  0x30   : > { %110 = sbr.rel (%p107_p3) target bundleno = 262 (0x106), region = 24  ;;  %s423_s24 = sshll.u32 (!%p107_p3), %s811_s23, 7 }
  0x31   : > { %s113_s26 = scalar_lea.sflag (!%p107_p3), [#allocation3], %s811_s23  ;;  %s815_s30 = scalar_lea.vmem (!%p107_p3), [#allocation2], %s423_s24 }
  0x37   : > { %668 = dma.done.wait (%p750_p6), %s113_s26, 2048  }
  0x38   : > { %670 = vsyncadd (%p750_p6), %s113_s26, 4294965248  ;;  %v822_v0 = vld [vmem:[%s815_s30 + $0x10] sm:$0xff]  ;;  %v825_v1 = vld [vmem:[%s815_s30] sm:$0xff]  ;;  %s424_s17 = sshll.u32 %s811_s23, 6  ;;  %s463_s27 = sshll.u32 %s728_s10, 10 }
  0x39   : > { %v828_v2 = vld [vmem:[%s815_s30 + $0x18] sm:$0xff]  ;;  %v155_v3 = vmul.f32 %v822_v0, %v822_v0  ;;  %v153_v4 = vmul.f32 %v825_v1, %v825_v1  ;;  %v835_v5 = vld [vmem:[%s815_s30 + $0x8] sm:$0xff]  ;;  %v845_v9 = vld [vmem:[%s815_s30 + $0x20] sm:$0xff]  ;;  %s906_s25 = scalar_lea.vmem [#allocation5], %s424_s17  ;;  %s932_s3 = scalar_lea.hbm %s980_s1, %s463_s27 }
  0x3a   : > { %v156_v6 = vmul.f32 %v828_v2, %v828_v2  ;;  %v154_v7 = vmul.f32 %v835_v5, %v835_v5  ;;  %v842_v8 = vld [vmem:[%s815_s30 + $0x28] sm:$0xff]  ;;  %v157_v11 = vmul.f32 %v845_v9, %v845_v9  ;;  %v852_v12 = vld [vmem:[%s815_s30 + $0x38] sm:$0xff]  ;;  %v855_v13 = vld [vmem:[%s815_s30 + $0x30] sm:$0xff]  ;;  %s343_s28 = sshll.u32 %s906_s25, 4  ;;  %s330_s10 = scalar_lea.sflag [#allocation4], %s811_s23  ;;  %s934_s28 = int_to_ptr.vmem [resolvable:$true] %s343_s28 }
  0x3b   : > { %173 = vadd.xlane.f32.xlu1 %v155_v3  ;;  %169 = vadd.xlane.f32.xlu0 %v153_v4  ;;  %v158_v10 = vmul.f32 %v842_v8, %v842_v8  ;;  %v160_v14 = vmul.f32 %v852_v12, %v852_v12  ;;  %v159_v15 = vmul.f32 %v855_v13, %v855_v13  ;;  %v862_v16 = vld [vmem:[%s815_s30 + $0x48] sm:$0xff]  ;;  %v865_v17 = vld [vmem:[%s815_s30 + $0x40] sm:$0xff]  ;;  %v872_v20 = vld [vmem:[%s815_s30 + $0x58] sm:$0xff]  ;;  %s623_s4 = scalar_lea.vmem %s934_s28, 1024  ;;  %p987_p11 = scmp.ne.s32.totalorder %s984_s18, 0 }
  0x3c   : > { %v162_v18 = vmul.f32 %v862_v16, %v862_v16  ;;  %v161_v19 = vmul.f32 %v865_v17, %v865_v17  ;;  %v875_v21 = vld [vmem:[%s815_s30 + $0x50] sm:$0xff]  ;;  %v164_v22 = vmul.f32 %v872_v20, %v872_v20  ;;  %v882_v24 = vld [vmem:[%s815_s30 + $0x68] sm:$0xff]  ;;  %v885_v25 = vld [vmem:[%s815_s30 + $0x60] sm:$0xff]  ;;  %p624_p6 = scmp.ne.s32.totalorder %s934_s28, %s623_s4  ;;  %s694_s5 = smov [#allocation5]  }
  0x3d   : > { %v163_v23 = vmul.f32 %v875_v21, %v875_v21  ;;  %v166_v26 = vmul.f32 %v882_v24, %v882_v24  ;;  %v165_v27 = vmul.f32 %v885_v25, %v885_v25  ;;  %v892_v28 = vld [vmem:[%s815_s30 + $0x78] sm:$0xff]  ;;  %v895_v29 = vld [vmem:[%s815_s30 + $0x70] sm:$0xff]  ;;  %s627_s11 = sshll.u32 %s694_s5, 4  ;;  %s628_s11 = int_to_ptr.vmem [resolvable:$false] %s627_s11 }
  0x3e   : > { %v168_v30 = vmul.f32 %v892_v28, %v892_v28  ;;  %v167_v31 = vmul.f32 %v895_v29, %v895_v29  ;;  %p625_p12 = pnand %p624_p6, %p987_p11  ;;  %s629_s13 = scalar_lea.vmem %s628_s11, 2048 }
  0x3f   : > { %175 = vadd.xlane.f32.xlu1 %v156_v6  ;;  %171 = vadd.xlane.f32.xlu0 %v154_v7  ;;  %p630_p8 = scmp.lt.s32.totalorder %s934_s28, %s628_s11  ;;  %p631_p10 = scmp.lt.s32.totalorder %s629_s13, %s623_s4 }
  0x40   : > { %p626_p13 = pneg %p625_p12 }
  0x41   : > { %p632_p0 = por %p631_p10, %p630_p8 }
  0x43   : > { %179 = vadd.xlane.f32.xlu1 %v158_v10  ;;  %177 = vadd.xlane.f32.xlu0 %v157_v11  ;;  %p633_p2 = pnand %p632_p0, %p626_p13 }
  0x47   : > { %183 = vadd.xlane.f32.xlu1 %v160_v14  ;;  %181 = vadd.xlane.f32.xlu0 %v159_v15 }
  0x4b   : > { %187 = vadd.xlane.f32.xlu1 %v162_v18  ;;  %185 = vadd.xlane.f32.xlu0 %v161_v19 }
  0x4f   : > { %191 = vadd.xlane.f32.xlu1 %v164_v22  ;;  %189 = vadd.xlane.f32.xlu0 %v163_v23 }
  0x53   : > { %195 = vadd.xlane.f32.xlu1 %v166_v26  ;;  %193 = vadd.xlane.f32.xlu0 %v165_v27 }
  0x57   : > { %199 = vadd.xlane.f32.xlu1 %v168_v30  ;;  %197 = vadd.xlane.f32.xlu0 %v167_v31 }
  0xc8   : > { %v174_v32 = vpop.xlane.xlu1 %173  ;;  %v170_v33 = vpop.xlane.xlu0 %169 }
  0xc9   : > { %v203_v34 = vmax.f32 %v174_v32, 1e-24  ;;  %v201_v35 = vmax.f32 %v170_v33, 1e-24 }
  0xcb   : > { %561 = vrsqrt.f32 %v203_v34 }
  0xcc   : > { %v176_v36 = vpop.xlane.xlu1 %175  ;;  %v172_v37 = vpop.xlane.xlu0 %171  ;;  %563 = vrsqrt.f32 %v201_v35 }
  0xcd   : > { %v204_v38 = vmax.f32 %v176_v36, 1e-24  ;;  %v202_v39 = vmax.f32 %v172_v37, 1e-24 }
  0xcf   : > { %565 = vrsqrt.f32 %v204_v38 }
  0xd0   : > { %567 = vrsqrt.f32 %v202_v39  ;;  %v180_v40 = vpop.xlane.xlu1 %179  ;;  %v178_v41 = vpop.xlane.xlu0 %177 }
  0xd1   : > { %v206_v42 = vmax.f32 %v180_v40, 1e-24  ;;  %v205_v43 = vmax.f32 %v178_v41, 1e-24 }
  0xd3   : > { %569 = vrsqrt.f32 %v206_v42 }
  0xd4   : > { %571 = vrsqrt.f32 %v205_v43  ;;  %v184_v44 = vpop.xlane.xlu1 %183  ;;  %v182_v45 = vpop.xlane.xlu0 %181 }
  0xd5   : > { %v208_v46 = vmax.f32 %v184_v44, 1e-24  ;;  %v207_v47 = vmax.f32 %v182_v45, 1e-24  ;;  %v562_v48 = vpop.eup %561 }
  0xd6   : > { %v564_v49 = vpop.eup %563  ;;  %v235_v56 = vmul.f32 %v562_v48, %v822_v0 }
  0xd7   : > { %573 = vrsqrt.f32 %v208_v46  ;;  %v233_v58 = vmul.f32 %v564_v49, %v825_v1 }
  0xd8   : > { %575 = vrsqrt.f32 %v207_v47  ;;  %v188_v50 = vpop.xlane.xlu1 %187  ;;  %v186_v51 = vpop.xlane.xlu0 %185 }
  0xd9   : > { %v566_v52 = vpop.eup %565  ;;  %v210_v53 = vmax.f32 %v188_v50, 1e-24  ;;  %v209_v54 = vmax.f32 %v186_v51, 1e-24 }
  0xda   : > { %v568_v55 = vpop.eup %567  ;;  %v236_v57 = vmul.f32 %v566_v52, %v828_v2 }
  0xdb   : > { %v234_v59 = vmul.f32 %v568_v55, %v835_v5  ;;  %577 = vrsqrt.f32 %v210_v53 }
  0xdc   : > { %v472_v60 = vpack.c.bf16 %v236_v57, %v235_v56  ;;  %579 = vrsqrt.f32 %v209_v54  ;;  %v192_v61 = vpop.xlane.xlu1 %191  ;;  %v190_v62 = vpop.xlane.xlu0 %189 }
  0xdd   : > { %v570_v63 = vpop.eup %569  ;;  %v467_v3 = vpack.c.bf16 %v234_v59, %v233_v58  ;;  %v212_v4 = vmax.f32 %v192_v61, 1e-24  ;;  %v211_v6 = vmax.f32 %v190_v62, 1e-24 }
  0xde   : > { %v572_v7 = vpop.eup %571  ;;  %504 = vst [vmem:[%s906_s25 + $0x8] sm:$0xff] %v472_v60   ;;  %v238_v0 = vmul.f32 %v570_v63, %v842_v8 }
  0xdf   : > { %468 = vst [vmem:[%s906_s25] sm:$0xff] %v467_v3   ;;  %v237_v1 = vmul.f32 %v572_v7, %v845_v9  ;;  %581 = vrsqrt.f32 %v212_v4 }
  0xe0   : > { %583 = vrsqrt.f32 %v211_v6  ;;  %v196_v2 = vpop.xlane.xlu1 %195  ;;  %v194_v5 = vpop.xlane.xlu0 %193 }
  0xe1   : > { %v574_v10 = vpop.eup %573  ;;  %v477_v11 = vpack.c.bf16 %v238_v0, %v237_v1  ;;  %v214_v14 = vmax.f32 %v196_v2, 1e-24  ;;  %v213_v15 = vmax.f32 %v194_v5, 1e-24 }
  0xe2   : > { %v576_v18 = vpop.eup %575  ;;  %v240_v19 = vmul.f32 %v574_v10, %v852_v12 }
  0xe3   : > { %505 = vst [vmem:[%s906_s25 + $0x10] sm:$0xff] %v477_v11   ;;  %v239_v22 = vmul.f32 %v576_v18, %v855_v13  ;;  %585 = vrsqrt.f32 %v214_v14 }
  0xe4   : > { %587 = vrsqrt.f32 %v213_v15  ;;  %v200_v8 = vpop.xlane.xlu1 %199  ;;  %v198_v9 = vpop.xlane.xlu0 %197 }
  0xe5   : > { %v578_v23 = vpop.eup %577  ;;  %v482_v26 = vpack.c.bf16 %v240_v19, %v239_v22  ;;  %v216_v27 = vmax.f32 %v200_v8, 1e-24  ;;  %v215_v30 = vmax.f32 %v198_v9, 1e-24 }
  0xe6   : > { %v580_v31 = vpop.eup %579  ;;  %v242_v32 = vmul.f32 %v578_v23, %v862_v16 }
  0xe7   : > { %506 = vst [vmem:[%s906_s25 + $0x18] sm:$0xff] %v482_v26   ;;  %v241_v33 = vmul.f32 %v580_v31, %v865_v17  ;;  %589 = vrsqrt.f32 %v216_v27 }
  0xe8   : > { %591 = vrsqrt.f32 %v215_v30 }
  0xe9   : > { %v582_v12 = vpop.eup %581  ;;  %v487_v13 = vpack.c.bf16 %v242_v32, %v241_v33 }
  0xea   : > { %v584_v34 = vpop.eup %583  ;;  %v244_v35 = vmul.f32 %v582_v12, %v872_v20 }
  0xeb   : > { %507 = vst [vmem:[%s906_s25 + $0x20] sm:$0xff] %v487_v13   ;;  %v243_v36 = vmul.f32 %v584_v34, %v875_v21 }
  0xed   : > { %v586_v37 = vpop.eup %585  ;;  %v492_v38 = vpack.c.bf16 %v244_v35, %v243_v36 }
  0xee   : > { %v588_v16 = vpop.eup %587  ;;  %v246_v17 = vmul.f32 %v586_v37, %v882_v24 }
  0xef   : > { %508 = vst [vmem:[%s906_s25 + $0x28] sm:$0xff] %v492_v38   ;;  %v245_v39 = vmul.f32 %v588_v16, %v885_v25 }
  0xf1   : > { %v590_v40 = vpop.eup %589  ;;  %v497_v41 = vpack.c.bf16 %v246_v17, %v245_v39 }
  0xf2   : > { %v592_v42 = vpop.eup %591  ;;  %v248_v20 = vmul.f32 %v590_v40, %v892_v28 }
  0xf3   : > { %509 = vst [vmem:[%s906_s25 + $0x30] sm:$0xff] %v497_v41   ;;  %v247_v21 = vmul.f32 %v592_v42, %v895_v29 }
  0xf5   : > { %v502_v24 = vpack.c.bf16 %v248_v20, %v247_v21 }
  0xf7   : > { %510 = vst [vmem:[%s906_s25 + $0x38] sm:$0xff] %v502_v24  }
  0xf8   : > { %636 = shalt.err (!%p633_p2)
}
  0xf9   : > { %s637_s14 = scalar_lea.hbm %s932_s3, 1024  ;;  %s641_s21 = scalar_lea.hbm %s980_s1, 2048 }
  0xfa   : > { %p638_p4 = scmp.ne.s32.totalorder %s932_s3, %s637_s14  ;;  %p642_p9 = scmp.lt.u32.totalorder %s932_s3, %s980_s1 }
  0xfb   : > { %p643_p1 = scmp.lt.u32.totalorder %s641_s21, %s637_s14  ;;  %p645_p6 = scmp.lt.u32.totalorder %s637_s14, %s932_s3 }
  0xfc   : > { %p639_p5 = pnand %p638_p4, %p987_p11 }
  0xfd   : > { %p644_p3 = por %p643_p1, %p642_p9 }
  0xfe   : > { %p640_p7 = pneg %p639_p5 }
  0xff   : > { %p646_p12 = por %p645_p6, %p644_p3 }
 0x101   : > { %p647_p13 = pnand %p646_p12, %p640_p7 }
 0x103   : > { %650 = shalt.err (!%p647_p13)
}
 0x104   : > { %s695_s26 = smov 64   ;;  %s696_s30 = smov 4  }
 0x105   : > { %513 = dma.vmem_to_hbm [thread:$0]  (%p987_p11), %s934_s28, 1024, %s932_s3, %s330_s10, %s695_s26, %s695_s26, %s696_s30  }
 0x106 PF: > { %s358_s17 = sand.u32 1, %s677_s6   ;;  %p988_p8 = scmp.ne.s32.totalorder %s985_s19, 0 }
 0x107   : > { %p989_p10 = scmp.ge.s32.totalorder %s689_s9, 2  ;;  %s359_s25 = scalar_lea.sflag [#allocation4], %s358_s17 }
 0x109   : > { %p520_p0 = pnand %p989_p10, %p988_p8 }
 0x10b   : > { %672 = dma.done.wait (!%p520_p0), %s359_s25, 1024  }
 0x10c   : > { %674 = vsyncadd (!%p520_p0), %s359_s25, 4294966272  ;;  %p14_p2 = scmp.ge.s32.totalorder %s732_s12, 4   ;;  %s990_s6 = smov %s681_s7 }
 0x10d   : > { %s991_s7 = smov %s685_s8  ;;  %s992_s8 = smov %s744_s15 }
 0x10e   : > { %s993_s9 = smov %s732_s12  ;;  %16 = sbr.rel (!%p14_p2) target bundleno = 5 (0x5), region = 69 }
 0x115   :  { %364 = vsyncpa [#allocation3], 1 }
 0x116   :  { %366 = vsyncpa [#allocation3 + $0x1], 1 }
 0x117   :  { %367 = vsyncpa [#allocation4], 1 }
 0x118   :  { %369 = vsyncpa [#allocation4 + $0x1], 1 }

</bundles_post_ra>
